<compile_context>
chip_gen: v7x
topology: tpu7x:2x2x1
jax: 0.10.0
libtpu: 0.0.40
codegen_flags: <defaults>
</compile_context>

<pallas_src>
import functools

import numpy as np

import jax
import jax.numpy as jnp
from jax import lax
from jax.experimental import pallas as pl
from jax.experimental.pallas import tpu as pltpu


_NUTRIENT_SCALES = np.array([257.4, 217.18, 12.86, 19.24, 18.44],
                            dtype=np.float32)


def make_weights():
    """Deterministic weights, mirroring WeightedMSELoss.__init__ (numpy)."""
    w = 1.0 / _NUTRIENT_SCALES ** 2
    w = w * (_NUTRIENT_SCALES.shape[0] / w.sum())
    return w.astype(np.float32)


def _cdiv(a, b):
    return -(-a // b)


# ---------------------------------------------------------------------------
# Tiny-batch path: single (B, N) block, SMEM scalar output.
# ---------------------------------------------------------------------------
def _wmse_small_kernel(pred_ref, tgt_ref, out_ref, *, w_folded):
    # pred_ref / tgt_ref: (B, N) in VMEM ; out_ref: (1, 1) in SMEM.
    p = pred_ref[...].astype(jnp.float32)
    t = tgt_ref[...].astype(jnp.float32)
    sq = (p - t) ** 2
    # Weight row (already folded with 1/(B*N)) rebuilt from an iota and
    # compile-time scalars: no weights input, no extra DMA, no divide.
    col = lax.broadcasted_iota(jnp.int32, sq.shape, 1)
    w = jnp.zeros(sq.shape, jnp.float32)
    for j, wj in enumerate(w_folded):        # unrolled, N == 5
        w = jnp.where(col == j, jnp.float32(wj), w)
    out_ref[0, 0] = jnp.sum(sq * w)


def _weighted_mse_small(predictions, targets, w_folded):
    B, N = predictions.shape
    kernel = functools.partial(_wmse_small_kernel, w_folded=w_folded)
    out = pl.pallas_call(
        kernel,
        out_shape=jax.ShapeDtypeStruct((1, 1), jnp.float32),
        in_specs=[
            pl.BlockSpec((B, N), lambda: (0, 0)),
            pl.BlockSpec((B, N), lambda: (0, 0)),
        ],
        out_specs=pl.BlockSpec(memory_space=pltpu.MemorySpace.SMEM),
    )(predictions, targets)
    return out[0, 0]


# ---------------------------------------------------------------------------
# Flat lane-dense path: (B, N) viewed as a (rows, N*128) slab, big row blocks,
# block-shaped VMEM accumulator, per-core column-sum partial outputs.
# ---------------------------------------------------------------------------
def _wmse_flat_kernel(pred_ref, tgt_ref, out_ref, acc_ref):
    # pred_ref / tgt_ref: (block_rows, C) ; out_ref: (1, 1, C) per-core partial;
    # acc_ref: (block_rows, C) f32 VMEM scratch.
    k = pl.program_id(1)

    @pl.when(k == 0)
    def _init():
        acc_ref[...] = jnp.zeros_like(acc_ref)

    p = pred_ref[...].astype(jnp.float32)
    t = tgt_ref[...].astype(jnp.float32)
    d = p - t
    acc_ref[...] += d * d          # plain VPU add; free filler under the DMA

    @pl.when(k == pl.num_programs(1) - 1)
    def _finalize():
        # One cross-sublane reduce per core; weights applied outside.
        out_ref[0] = jnp.sum(acc_ref[...], axis=0, keepdims=True)


def _weighted_mse_flat(predictions, targets, w_np, *, max_block_rows=1024,
                       use_two_cores=True):
    B, N = predictions.shape
    assert max_block_rows % 8 == 0, "max_block_rows must be a multiple of 8"
    C = N * 128                     # 640: lane-dense, weight is f(col % N)
    L = B * N
    rows_needed = _cdiv(L, C)

    if rows_needed <= max_block_rows:
        block_rows, n_blocks, num_cores = rows_needed, 1, 1
    else:
        block_rows = max_block_rows
        n_blocks = _cdiv(rows_needed, block_rows)
        num_cores = 2 if (use_two_cores and n_blocks >= 2) else 1
    blocks_per_core = _cdiv(n_blocks, num_cores)
    total_rows = num_cores * blocks_per_core * block_rows
    l_pad = total_rows * C

    # Metadata-only flatten of the contiguous row-major arrays; the cheap
    # contiguous zero-pad replaces the old strided (B,5)->(5,B) transpose copy.
    pflat = predictions.reshape(-1)
    tflat = targets.reshape(-1)
    if l_pad != L:
        pflat = jnp.pad(pflat, (0, l_pad - L))
        tflat = jnp.pad(tflat, (0, l_pad - L))
    p2 = pflat.reshape(total_rows, C)
    t2 = tflat.reshape(total_rows, C)

    in_map = lambda c, k: (c * blocks_per_core + k, 0)
    out = pl.pallas_call(
        _wmse_flat_kernel,
        out_shape=jax.ShapeDtypeStruct((num_cores, 1, C), jnp.float32),
        grid_spec=pltpu.PrefetchScalarGridSpec(
            num_scalar_prefetch=0,
            grid=(num_cores, blocks_per_core),
            in_specs=[
                pl.BlockSpec((block_rows, C), in_map),
                pl.BlockSpec((block_rows, C), in_map),
            ],
            out_specs=pl.BlockSpec((1, 1, C), lambda c, k: (c, 0, 0)),
            scratch_shapes=[pltpu.VMEM((block_rows, C), jnp.float32)],
        ),
        compiler_params=pltpu.CompilerParams(
            dimension_semantics=("parallel", "arbitrary"),
            vmem_limit_bytes=32 << 20),
    )(p2, t2)

    # Weight (folded with 1/(B*N)) applied once to the per-column sums: flat
    # index r*C + c has nutrient index c % N (since C % N == 0); zero-padded
    # positions contribute exactly 0, so no mask is needed.
    w_row = jnp.asarray(np.tile(w_np, C // N) / float(L), dtype=jnp.float32)
    col_sums = jnp.sum(out.reshape(num_cores, C), axis=0)
    return jnp.sum(col_sums * w_row)


def weighted_mse_loss(predictions, targets, weights=None, *,
                      small_batch_threshold=64, max_block_rows=1024,
                      use_two_cores=True):
    """Weighted MSE: mean((pred - tgt)**2 * weights[None, :]). Returns f32 scalar.

    `weights` must be host-concrete at trace time (the module derives it
    deterministically from fixed nutrient scales); it is folded with the
    1/(B*N) mean factor outside the kernel.
    """
    B, N = predictions.shape
    if weights is None:
        weights = make_weights()
    try:
        w_np = np.asarray(weights, dtype=np.float32).reshape(N)
    except Exception as e:
        raise ValueError(
            "`weights` must be host-concrete (numpy or a concrete jax array); "
            "it is folded into the kernel at trace time.") from e

    if B <= small_batch_threshold:
        w_folded = tuple(float(x) for x in (w_np / (B * N)))
        return _weighted_mse_small(predictions, targets, w_folded)
    return _weighted_mse_flat(predictions, targets, w_np,
                              max_block_rows=max_block_rows,
                              use_two_cores=use_two_cores)


if __name__ == "__main__":
    key = jax.random.PRNGKey(0)
    k1, k2, k3, k4, k5, k6 = jax.random.split(key, 6)

    N = 5
    weights = make_weights()
    w_j = jnp.asarray(weights)

    # --- tiny-batch single-block path (the shape the module's loss sees) ---
    B = 8
    p1 = jax.random.normal(k1, (B, N), dtype=jnp.float32) * 50.0
    t1 = jax.random.normal(k2, (B, N), dtype=jnp.float32) * 50.0
    loss1 = jax.block_until_ready(weighted_mse_loss(p1, t1, weights))
    ref1 = jnp.mean((p1 - t1) ** 2 * w_j[None, :])
    assert jnp.allclose(loss1, ref1, rtol=1e-4, atol=1e-6), (loss1, ref1)

    # --- flat lane-dense path, single block (non-multiple batch, tiny pad) ---
    B2 = 300
    p2 = jax.random.normal(k3, (B2, N), dtype=jnp.float32) * 50.0
    t2 = jax.random.normal(k4, (B2, N), dtype=jnp.float32) * 50.0
    loss2 = jax.block_until_ready(weighted_mse_loss(p2, t2, weights))
    ref2 = jnp.mean((p2 - t2) ** 2 * w_j[None, :])
    assert jnp.allclose(loss2, ref2, rtol=1e-4, atol=1e-6), (loss2, ref2)

    # --- flat path, multi-block grid + 2-way "parallel" core axis (forced by
    #     a small max_block_rows so the pattern is exercised at small shape) ---
    B3 = 4000
    p3 = jax.random.normal(k5, (B3, N), dtype=jnp.float32) * 50.0
    t3 = jax.random.normal(k6, (B3, N), dtype=jnp.float32) * 50.0
    loss3 = jax.block_until_ready(
        weighted_mse_loss(p3, t3, weights, max_block_rows=8))
    ref3 = jnp.mean((p3 - t3) ** 2 * w_j[None, :])
    assert jnp.allclose(loss3, ref3, rtol=1e-4, atol=1e-6), (loss3, ref3)

    print("KERNEL_OK")
</pallas_src>

<mosaic_0001>
module attributes {stable_mosaic.version = 11 : i64} {
  func.func @_wmse_small_kernel(%arg0: memref<8x5xf32, #tpu.memory_space<vmem>>, %arg1: memref<8x5xf32, #tpu.memory_space<vmem>>, %arg2: memref<1x1xf32, #tpu.memory_space<smem>>) attributes {dimension_semantics = [], scalar_prefetch = 0 : i64, scratch_operands = 0 : i64, tpu.core_type = #tpu.core_type<tc>} {
    %c0 = arith.constant 0 : index
    %c0_0 = arith.constant 0 : index
    %0 = vector.load %arg0[%c0, %c0_0] : memref<8x5xf32, #tpu.memory_space<vmem>>, vector<8x5xf32>
    %c0_1 = arith.constant 0 : index
    %c0_2 = arith.constant 0 : index
    %1 = vector.load %arg1[%c0_1, %c0_2] : memref<8x5xf32, #tpu.memory_space<vmem>>, vector<8x5xf32>
    %2 = arith.subf %0, %1 : vector<8x5xf32>
    %3 = arith.mulf %2, %2 : vector<8x5xf32>
    %4 = tpu.iota {dimensions = array<i32: 1>} : vector<8x5xi32>
    %cst = arith.constant 0.000000e+00 : f32
    %5 = vector.broadcast %cst : f32 to vector<8x5xf32>
    %c0_i32 = arith.constant 0 : i32
    %6 = vector.broadcast %c0_i32 : i32 to vector<8x5xi32>
    %7 = arith.cmpi eq, %4, %6 : vector<8x5xi32>
    %cst_3 = arith.constant 1.60905038E-4 : f32
    %8 = vector.broadcast %cst_3 : f32 to vector<8x5xf32>
    %9 = arith.select %7, %8, %5 : vector<8x5xi1>, vector<8x5xf32>
    %c1_i32 = arith.constant 1 : i32
    %10 = vector.broadcast %c1_i32 : i32 to vector<8x5xi32>
    %11 = arith.cmpi eq, %4, %10 : vector<8x5xi32>
    %cst_4 = arith.constant 2.26020114E-4 : f32
    %12 = vector.broadcast %cst_4 : f32 to vector<8x5xf32>
    %13 = arith.select %11, %12, %9 : vector<8x5xi1>, vector<8x5xf32>
    %c2_i32 = arith.constant 2 : i32
    %14 = vector.broadcast %c2_i32 : i32 to vector<8x5xi32>
    %15 = arith.cmpi eq, %4, %14 : vector<8x5xi32>
    %cst_5 = arith.constant 0.0644621551 : f32
    %16 = vector.broadcast %cst_5 : f32 to vector<8x5xf32>
    %17 = arith.select %15, %16, %13 : vector<8x5xi1>, vector<8x5xf32>
    %c3_i32 = arith.constant 3 : i32
    %18 = vector.broadcast %c3_i32 : i32 to vector<8x5xi32>
    %19 = arith.cmpi eq, %4, %18 : vector<8x5xi32>
    %cst_6 = arith.constant 0.0287989471 : f32
    %20 = vector.broadcast %cst_6 : f32 to vector<8x5xf32>
    %21 = arith.select %19, %20, %17 : vector<8x5xi1>, vector<8x5xf32>
    %c4_i32 = arith.constant 4 : i32
    %22 = vector.broadcast %c4_i32 : i32 to vector<8x5xi32>
    %23 = arith.cmpi eq, %4, %22 : vector<8x5xi32>
    %cst_7 = arith.constant 0.0313519724 : f32
    %24 = vector.broadcast %cst_7 : f32 to vector<8x5xf32>
    %25 = arith.select %23, %24, %21 : vector<8x5xi1>, vector<8x5xf32>
    %26 = arith.mulf %3, %25 : vector<8x5xf32>
    %27 = vector.shape_cast %26 : vector<8x5xf32> to vector<1x8x5xf32>
    %cst_8 = arith.constant dense<0.000000e+00> : vector<1xf32>
    %28 = vector.multi_reduction <add>, %27, %cst_8 [1, 2] : vector<1x8x5xf32> to vector<1xf32>
    %29 = vector.shape_cast %28 : vector<1xf32> to vector<1x1x1xf32>
    %30 = vector.extract %29[0, 0, 0] : f32 from vector<1x1x1xf32>
    %c0_9 = arith.constant 0 : index
    %c0_10 = arith.constant 0 : index
    %31 = memref.load %arg2[%c0_9, %c0_10] : memref<1x1xf32, #tpu.memory_space<smem>>
    memref.store %30, %arg2[%c0_9, %c0_10] : memref<1x1xf32, #tpu.memory_space<smem>>
    return
  }
}

</mosaic_0001>

<bundles_post_ra>
// kernel: tpu_custom_call.1
= control target key start
LH: loop header
LB: loop body
LE: loop exit
PB: predicated region body
PF: predicated region fallthrough
CT: control target
= control target key end

     0   :  { %7 = vsyncpa [#allocation3], 0  ;;  %s202_s0 = inlined_call_operand.hbm [shape: f32[8,5], index: 0, kind: input, shape index: {}]   ;;  %s203_s1 = inlined_call_operand.hbm [shape: f32[8,5], index: 1, kind: input, shape index: {}]   ;;  %s204_s2 = inlined_call_operand.hbm [shape: f32[1,1], index: 2, kind: output, shape index: {}]  }
   0x1   :  { %8 = vsyncpa [#allocation6], 0 }
   0x2   :  { %9 = vsyncpa [#allocation4], 0  ;;  %s147_s9 = smov [#allocation2]   ;;  %s148_s11 = smov [#allocation5]  }
   0x3   :  { %s16_s10 = sshll.u32 %s147_s9, 4  ;;  %s26_s12 = sshll.u32 %s148_s11, 4  ;;  %s17_s10 = int_to_ptr.vmem [resolvable:$true] %s16_s10  ;;  %s27_s12 = int_to_ptr.vmem [resolvable:$true] %s26_s12 }
   0x4   :  { %s87_s15 = scalar_lea.hbm %s202_s0, 128 }
   0x5   :  { %p88_p0 = scmp.ne.s32.totalorder %s202_s0, %s87_s15  ;;  %p91_p1 = scmp.lt.u32.totalorder %s87_s15, %s202_s0 }
   0x7   :  { %p93_p2 = pnand %p91_p1, %p88_p0 }
   0x9   :  { %96 = shalt.err (!%p93_p2)
}
   0xa   :  { %s97_s20 = scalar_lea.vmem %s17_s10, 128  ;;  %p102_p4 = scmp.lt.s32.totalorder %s17_s10, %s17_s10 }
   0xb   :  { %p98_p3 = scmp.ne.s32.totalorder %s17_s10, %s97_s20  ;;  %p103_p5 = scmp.lt.s32.totalorder %s97_s20, %s97_s20 }
   0xd   :  { %p104_p6 = por %p103_p5, %p102_p4 }
   0xf   :  { %p105_p7 = pnand %p104_p6, %p98_p3 }
  0x11   :  { %108 = shalt.err (!%p105_p7)
}
  0x12   :  { %19 = dma.hbm_to_vmem [thread:$0]  %s202_s0, 128, %s17_s10, [#allocation3]  }
  0x13   :  { %s109_s25 = scalar_lea.hbm %s203_s1, 128 }
  0x14   :  { %p110_p8 = scmp.ne.s32.totalorder %s203_s1, %s109_s25  ;;  %p113_p9 = scmp.lt.u32.totalorder %s109_s25, %s203_s1 }
  0x16   :  { %p115_p10 = pnand %p113_p9, %p110_p8 }
  0x18   :  { %118 = shalt.err (!%p115_p10)
}
  0x19   :  { %s119_s30 = scalar_lea.vmem %s27_s12, 128  ;;  %p124_p12 = scmp.lt.s32.totalorder %s27_s12, %s27_s12 }
  0x1a   :  { %p120_p11 = scmp.ne.s32.totalorder %s27_s12, %s119_s30  ;;  %p125_p13 = scmp.lt.s32.totalorder %s119_s30, %s119_s30 }
  0x1c   :  { %p126_p0 = por %p125_p13, %p124_p12 }
  0x1e   :  { %p127_p1 = pnand %p126_p0, %p120_p11 }
  0x20   :  { %130 = shalt.err (!%p127_p1)
}
  0x21   :  { %29 = dma.hbm_to_vmem [thread:$0]  %s203_s1, 128, %s27_s12, [#allocation6]  }
  0x22   :  { %141 = dma.done.wait [#allocation3], 128  }
  0x23   :  { %142 = vsyncadd [#allocation3], 4294967168 }
  0x24   :  { %143 = dma.done.wait [#allocation6], 128  }
  0x25   :  { %144 = vsyncadd [#allocation6], 4294967168  ;;  %v40_v0 = vlaneseq  ;;  %v149_v2 = vmov 0.0   ;;  %v36_v5 = vld [vmem:[#allocation2] sm:$0xff]  ;;  %v37_v6 = vld [vmem:[#allocation5] sm:$0xff]  ;;  %vm53_vm5 = vcmask 39936  }
  0x26   :  { %v38_v8 = vsub.f32 %v36_v5, %v37_v6  ;;  %s131_s6 = scalar_lea.hbm %s204_s2, 16 }
  0x27   :  { %v41_v1 = vand.u32 127, %v40_v0  ;;  %p132_p2 = scmp.ne.s32.totalorder %s204_s2, %s131_s6  ;;  %p135_p3 = scmp.lt.u32.totalorder %s131_s6, %s204_s2 }
  0x28   :  { %v39_v11 = vmul.f32 %v38_v8, %v38_v8 }
  0x29   :  { %vm42_vm0 = vcmp.eq.s32.totalorder %v41_v1, 0  ;;  %vm44_vm1 = vcmp.eq.s32.totalorder %v41_v1, 1  ;;  %vm46_vm2 = vcmp.eq.s32.totalorder %v41_v1, 2  ;;  %vm48_vm3 = vcmp.eq.s32.totalorder %v41_v1, 3  ;;  %p137_p4 = pnand %p135_p3, %p132_p2 }
  0x2a   :  { %v43_v3 = vsel %vm42_vm0, 0.00016090504, %v149_v2  ;;  %vm50_vm4 = vcmp.eq.s32.totalorder %v41_v1, 4 }
  0x2b   :  { %v45_v4 = vsel %vm44_vm1, 0.00022602011, %v43_v3 }
  0x2c   :  { %v47_v7 = vsel %vm46_vm2, 0.064462155, %v45_v4 }
  0x2d   :  { %v49_v9 = vsel %vm48_vm3, 0.028798947, %v47_v7 }
  0x2e   :  { %v51_v10 = vsel %vm50_vm4, 0.031351972, %v49_v9 }
  0x2f   :  { %v52_v12 = vmul.f32 %v51_v10, %v39_v11 }
  0x31   :  { %v54_v13 = vsel %vm53_vm5, %v52_v12, 0.0 }
  0x32   :  { %55 = vadd.xlane.f32.xlu0 %v54_v13 }
  0xbf   :  { %v56_v14 = vpop.xlane.xlu0 %55 }
  0xc0   :  { %v57_v15 = vrot.slane %v56_v14, 4 }
  0xc2   :  { %v58_v16 = vadd.f32 %v57_v15, %v56_v14 }
  0xc4   :  { %v59_v17 = vrot.slane %v58_v16, 2 }
  0xc6   :  { %v60_v18 = vadd.f32 %v59_v17, %v58_v16 }
  0xc8   :  { %v61_v19 = vrot.slane %v60_v18, 1 }
  0xca   :  { %v62_v20 = vadd.f32 %v61_v19, %v60_v18 }
  0xcc   :  { %81 = vpush %v62_v20 }
  0xfd   :  { %s82_s1 = spop %81 }
  0xfe   :  { %65 = sst [smem:[#allocation7]] %s82_s1 }
  0xff   :  { %140 = shalt.err (!%p137_p4)
}
 0x100   :  { %s150_s11 = smov [#allocation7]  }
 0x101   :  { %73 = dma.smem_to_hbm %s150_s11, 16, %s204_s2, [#allocation4]  }
 0x102   :  { %145 = dma.done.wait [#allocation4], 16  }
 0x103   :  { %146 = vsyncadd [#allocation4], 4294967280 }
 0x104   :  { %77 = sfence }
 0x105   :  { %78 = vsyncpa [#allocation3], 1 }
 0x106   :  { %79 = vsyncpa [#allocation6], 1 }
 0x107   :  { %80 = vsyncpa [#allocation4], 1 }

</bundles_post_ra>
